<compile_context>
chip_gen: v7x
topology: tpu7x:2x2x1
jax: 0.10.0
libtpu: 0.0.40
codegen_flags: <defaults>
</compile_context>

<pallas_src>
import jax
import jax.numpy as jnp
from jax.experimental import pallas as pl
from jax.experimental.pallas import tpu as pltpu


def ff_kernel(x_ref, w1_ref, b1_ref, w2_ref, b2_ref, o_ref, acc_ref):
    # Grid: (row blocks, F_o reduction blocks). Reduction axis is last.
    k = pl.program_id(1)

    @pl.when(k == 0)
    def _init():
        acc_ref[...] = jnp.zeros_like(acc_ref)

    # First matmul chunk: [TM, F_in] @ [F_in, TK] -> f32 accumulate on MXU.
    h = jnp.dot(x_ref[...], w1_ref[...], preferred_element_type=jnp.float32)
    # Bias + ReLU in f32.
    h = jnp.maximum(h + b1_ref[...], 0.0)

    # Dropout: identity (eval mode).

    # Second matmul chunk: [TM, TK] @ [TK, F_in], accumulated into the resident
    # f32 VMEM accumulator (splitting the F_o contraction over k is exact).
    acc_ref[...] += jnp.dot(h.astype(w2_ref.dtype), w2_ref[...],
                            preferred_element_type=jnp.float32)

    @pl.when(k == pl.num_programs(1) - 1)
    def _finalize():
        o_ref[...] = (acc_ref[...] + b2_ref[...]).astype(o_ref.dtype)


def ff_forward(x, w1, b1, w2, b2, *, block_rows=256, block_k=512,
               compute_dtype=jnp.bfloat16, vmem_limit_bytes=None):
    """FF forward.

    x: [..., F_in]  (leading dims are flattened into a token/row axis)
    w1: [F_in, F_o], b1: [F_o]  (stored transposed w.r.t. PyTorch nn.Linear)
    w2: [F_o, F_in], b2: [F_in]
    """
    orig_shape = x.shape
    F_in = orig_shape[-1]
    x2 = x.reshape(-1, F_in)
    B = x2.shape[0]
    F_o = w1.shape[1]
    out_dtype = x.dtype

    # Row (token) tile. MXU/lane friendly when it is a multiple of 128; for
    # tiny inputs just use the whole row axis (block == full dim is legal).
    TM = block_rows if B > block_rows else B

    # Reduction tile over F_o. It must evenly divide F_o: the second matmul
    # contracts over this axis, so OOB padding of a partial block would corrupt
    # real outputs. Otherwise fall back to a single (un-tiled) F_o block.
    if F_o > block_k and F_o % block_k == 0:
        TK = block_k
    else:
        TK = F_o

    grid = (pl.cdiv(B, TM), F_o // TK)

    # bf16 MXU inputs, f32 biases / accumulation / epilogue.
    xc = x2.astype(compute_dtype)
    w1c = w1.astype(compute_dtype)
    w2c = w2.astype(compute_dtype)
    b1f = b1.reshape(1, F_o).astype(jnp.float32)
    b2f = b2.reshape(1, F_in).astype(jnp.float32)

    cost = pl.CostEstimate(
        flops=4 * B * F_in * F_o,          # two matmuls, 2*B*F_in*F_o each
        transcendentals=0,
        bytes_accessed=(xc.size * xc.dtype.itemsize
                        + w1c.size * w1c.dtype.itemsize
                        + w2c.size * w2c.dtype.itemsize
                        + b1f.size * 4 + b2f.size * 4
                        + B * F_in * jnp.dtype(out_dtype).itemsize),
    )

    out2 = pl.pallas_call(
        ff_kernel,
        out_shape=jax.ShapeDtypeStruct((B, F_in), out_dtype),
        grid=grid,
        in_specs=[
            # x tile: revisited across k (Pallas skips re-DMA when the block
            # index is unchanged between consecutive steps).
            pl.BlockSpec((TM, F_in), lambda i, k: (i, 0)),
            pl.BlockSpec((F_in, TK), lambda i, k: (0, k)),   # w1 column chunk
            pl.BlockSpec((1, TK),    lambda i, k: (0, k)),   # b1 chunk
            pl.BlockSpec((TK, F_in), lambda i, k: (k, 0)),   # w2 row chunk
            pl.BlockSpec((1, F_in),  lambda i, k: (0, 0)),   # b2 (resident)
        ],
        out_specs=pl.BlockSpec((TM, F_in), lambda i, k: (i, 0)),
        scratch_shapes=[pltpu.VMEM((TM, F_in), jnp.float32)],
        compiler_params=pltpu.CompilerParams(
            dimension_semantics=("parallel", "arbitrary"),
            vmem_limit_bytes=vmem_limit_bytes),
        cost_estimate=cost,
    )(xc, w1c, b1f, w2c, b2f)

    return out2.reshape(orig_shape)


def init_ff_params(key, F_in, F_o, dtype=jnp.float32):
    """Deterministic init mimicking nn.Linear's uniform(-1/sqrt(fan_in), +)."""
    k1, k2, k3, k4 = jax.random.split(key, 4)
    bound1 = 1.0 / jnp.sqrt(jnp.float32(F_in))
    bound2 = 1.0 / jnp.sqrt(jnp.float32(F_o))
    # Stored transposed w.r.t. PyTorch so the kernel does x @ W directly.
    w1 = jax.random.uniform(k1, (F_in, F_o), dtype, -bound1, bound1)
    b1 = jax.random.uniform(k2, (F_o,), dtype, -bound1, bound1)
    w2 = jax.random.uniform(k3, (F_o, F_in), dtype, -bound2, bound2)
    b2 = jax.random.uniform(k4, (F_in,), dtype, -bound2, bound2)
    return w1, b1, w2, b2


if __name__ == "__main__":
    # Small ViT-like shapes: batch=2, 16x16 image, 4 channels, patch=4
    # -> 16 patches + 1 cls token = 17 tokens per image (34 token rows total),
    # token width F_in = 128, mlp_dim F_o = 256 (lane-aligned feature dims).
    batch, seq_len = 2, 17
    F_in, F_o = 128, 256

    key = jax.random.PRNGKey(0)
    kx, kp = jax.random.split(key)
    x = jax.random.normal(kx, (batch, seq_len, F_in), jnp.float32)
    w1, b1, w2, b2 = init_ff_params(kp, F_in, F_o)

    # 1) Default (perf-oriented) tiling; at these toy sizes it collapses to a
    #    single row block and a single F_o block.
    out = ff_forward(x, w1, b1, w2, b2)
    out = jax.block_until_ready(out)

    # 2) Small tiles to exercise the multi-row-block (incl. masked remainder)
    #    and K-accumulation paths of the same kernel.
    out_tiled = ff_forward(x, w1, b1, w2, b2, block_rows=16, block_k=128)
    out_tiled = jax.block_until_ready(out_tiled)

    # Pure-JAX reference matching the kernel's bf16-input / f32-accumulate
    # numerics (bf16 is an intentional inference-mode precision choice).
    f32 = jnp.float32
    xb = x.astype(jnp.bfloat16).astype(f32)
    w1b = w1.astype(jnp.bfloat16).astype(f32)
    w2b = w2.astype(jnp.bfloat16).astype(f32)
    h_ref = jnp.maximum(xb @ w1b + b1.reshape(1, -1), 0.0)
    ref = h_ref.astype(jnp.bfloat16).astype(f32) @ w2b + b2.reshape(1, -1)

    assert out.shape == (batch, seq_len, F_in)
    assert out_tiled.shape == (batch, seq_len, F_in)
    assert jnp.allclose(out, ref, atol=2e-2, rtol=2e-2)
    assert jnp.allclose(out_tiled, ref, atol=2e-2, rtol=2e-2)

    print("KERNEL_OK")
</pallas_src>

<mosaic_0001>
module attributes {stable_mosaic.version = 11 : i64} {
  func.func @ff_kernel(%arg0: i32, %arg1: i32, %arg2: memref<34x128xbf16, #tpu.memory_space<vmem>>, %arg3: memref<128x256xbf16, #tpu.memory_space<vmem>>, %arg4: memref<1x256xf32, #tpu.memory_space<vmem>>, %arg5: memref<256x128xbf16, #tpu.memory_space<vmem>>, %arg6: memref<1x128xf32, #tpu.memory_space<vmem>>, %arg7: memref<34x128xf32, #tpu.memory_space<vmem>>, %arg8: memref<34x128xf32, #tpu.memory_space<vmem>>) attributes {dimension_semantics = [#tpu.dimension_semantics<parallel>, #tpu.dimension_semantics<arbitrary>], iteration_bounds = array<i64: 1, 1>, scalar_prefetch = 0 : i64, scratch_operands = 1 : i64, tpu.core_type = #tpu.core_type<tc>, window_params = [{transform_indices = @transform_0, window_bounds = array<i64: 34, 128>}, {transform_indices = @transform_1, window_bounds = array<i64: 128, 256>}, {transform_indices = @transform_2, window_bounds = array<i64: 1, 256>}, {transform_indices = @transform_3, window_bounds = array<i64: 256, 128>}, {pipeline_mode = #tpu.pipeline_mode<synchronous>, transform_indices = @transform_4, window_bounds = array<i64: 1, 128>}, {transform_indices = @transform_5, window_bounds = array<i64: 34, 128>}]} {
    %c0_i32 = arith.constant 0 : i32
    %0 = arith.cmpi eq, %arg1, %c0_i32 : i32
    %1 = arith.extui %0 : i1 to i32
    %c0_i32_0 = arith.constant 0 : i32
    %2 = arith.cmpi ne, %1, %c0_i32_0 : i32
    scf.if %2 {
      %cst_16 = arith.constant 0.000000e+00 : f32
      %20 = vector.broadcast %cst_16 : f32 to vector<34x128xf32>
      %c0_17 = arith.constant 0 : index
      %c0_18 = arith.constant 0 : index
      %21 = vector.load %arg8[%c0_17, %c0_18] : memref<34x128xf32, #tpu.memory_space<vmem>>, vector<34x128xf32>
      tpu.vector_store %arg8[%c0_17, %c0_18], %20 {strides = array<i32>} : memref<34x128xf32, #tpu.memory_space<vmem>>, vector<34x128xf32>,
    } else {
    }
    %c0 = arith.constant 0 : index
    %c0_1 = arith.constant 0 : index
    %3 = vector.load %arg2[%c0, %c0_1] : memref<34x128xbf16, #tpu.memory_space<vmem>>, vector<34x128xbf16>
    %c0_2 = arith.constant 0 : index
    %c0_3 = arith.constant 0 : index
    %4 = vector.load %arg3[%c0_2, %c0_3] : memref<128x256xbf16, #tpu.memory_space<vmem>>, vector<128x256xbf16>
    %cst = arith.constant dense<0.000000e+00> : vector<34x256xf32>
    %5 = tpu.matmul %3, %4, %cst {dimension_numbers = #tpu.dot_dimension_numbers<[1], [0], [0], [1], [0, 0, 1, 1], [], []>} : vector<34x128xbf16>, vector<128x256xbf16>, vector<34x256xf32> -> vector<34x256xf32>
    %c0_4 = arith.constant 0 : index
    %c0_5 = arith.constant 0 : index
    %6 = vector.load %arg4[%c0_4, %c0_5] : memref<1x256xf32, #tpu.memory_space<vmem>>, vector<1x256xf32>
    %7 = vector.broadcast %6 : vector<1x256xf32> to vector<34x256xf32>
    %8 = arith.addf %5, %7 : vector<34x256xf32>
    %cst_6 = arith.constant 0.000000e+00 : f32
    %9 = vector.broadcast %cst_6 : f32 to vector<34x256xf32>
    %10 = arith.maximumf %8, %9 : vector<34x256xf32>
    %c0_7 = arith.constant 0 : index
    %c0_8 = arith.constant 0 : index
    %11 = vector.load %arg8[%c0_7, %c0_8] : memref<34x128xf32, #tpu.memory_space<vmem>>, vector<34x128xf32>
    %12 = arith.truncf %10 : vector<34x256xf32> to vector<34x256xbf16>
    %c0_9 = arith.constant 0 : index
    %c0_10 = arith.constant 0 : index
    %13 = vector.load %arg5[%c0_9, %c0_10] : memref<256x128xbf16, #tpu.memory_space<vmem>>, vector<256x128xbf16>
    %cst_11 = arith.constant dense<0.000000e+00> : vector<34x128xf32>
    %14 = tpu.matmul %12, %13, %cst_11 {dimension_numbers = #tpu.dot_dimension_numbers<[1], [0], [0], [1], [0, 0, 1, 1], [], []>} : vector<34x256xbf16>, vector<256x128xbf16>, vector<34x128xf32> -> vector<34x128xf32>
    %15 = arith.addf %11, %14 : vector<34x128xf32>
    %c0_12 = arith.constant 0 : index
    %c0_13 = arith.constant 0 : index
    %16 = vector.load %arg8[%c0_12, %c0_13] : memref<34x128xf32, #tpu.memory_space<vmem>>, vector<34x128xf32>
    tpu.vector_store %arg8[%c0_12, %c0_13], %15 {strides = array<i32>} : memref<34x128xf32, #tpu.memory_space<vmem>>, vector<34x128xf32>,
    %c0_i32_14 = arith.constant 0 : i32
    %17 = arith.cmpi eq, %arg1, %c0_i32_14 : i32
    %18 = arith.extui %17 : i1 to i32
    %c0_i32_15 = arith.constant 0 : i32
    %19 = arith.cmpi ne, %18, %c0_i32_15 : i32
    scf.if %19 {
      %c0_16 = arith.constant 0 : index
      %c0_17 = arith.constant 0 : index
      %20 = vector.load %arg8[%c0_16, %c0_17] : memref<34x128xf32, #tpu.memory_space<vmem>>, vector<34x128xf32>
      %c0_18 = arith.constant 0 : index
      %c0_19 = arith.constant 0 : index
      %21 = vector.load %arg6[%c0_18, %c0_19] : memref<1x128xf32, #tpu.memory_space<vmem>>, vector<1x128xf32>
      %22 = vector.broadcast %21 : vector<1x128xf32> to vector<34x128xf32>
      %23 = arith.addf %20, %22 : vector<34x128xf32>
      %c0_20 = arith.constant 0 : index
      %c0_21 = arith.constant 0 : index
      %24 = vector.load %arg7[%c0_20, %c0_21] : memref<34x128xf32, #tpu.memory_space<vmem>>, vector<34x128xf32>
      tpu.vector_store %arg7[%c0_20, %c0_21], %23 {strides = array<i32>} : memref<34x128xf32, #tpu.memory_space<vmem>>, vector<34x128xf32>,
    } else {
    }
    return
  }
  func.func @transform_0(%arg0: i32, %arg1: i32) -> (i32, i32) {
    %c0_i32 = arith.constant 0 : i32
    %c0_i32_0 = arith.constant 0 : i32
    return %arg0, %c0_i32 : i32, i32
  }
  func.func @transform_1(%arg0: i32, %arg1: i32) -> (i32, i32) {
    %c0_i32 = arith.constant 0 : i32
    %c0_i32_0 = arith.constant 0 : i32
    return %c0_i32, %arg1 : i32, i32
  }
  func.func @transform_2(%arg0: i32, %arg1: i32) -> (i32, i32) {
    %c0_i32 = arith.constant 0 : i32
    %c0_i32_0 = arith.constant 0 : i32
    return %c0_i32, %arg1 : i32, i32
  }
  func.func @transform_3(%arg0: i32, %arg1: i32) -> (i32, i32) {
    %c0_i32 = arith.constant 0 : i32
    %c0_i32_0 = arith.constant 0 : i32
    return %arg1, %c0_i32 : i32, i32
  }
  func.func @transform_4(%arg0: i32, %arg1: i32) -> (i32, i32) {
    %c0_i32 = arith.constant 0 : i32
    %c0_i32_0 = arith.constant 0 : i32
    %c0_i32_1 = arith.constant 0 : i32
    return %c0_i32, %c0_i32_0 : i32, i32
  }
  func.func @transform_5(%arg0: i32, %arg1: i32) -> (i32, i32) {
    %c0_i32 = arith.constant 0 : i32
    %c0_i32_0 = arith.constant 0 : i32
    return %arg0, %c0_i32 : i32, i32
  }
}

</mosaic_0001>

<bundles_post_ra>
// kernel: tpu_custom_call.1
= control target key start
LH: loop header
LB: loop body
LE: loop exit
PB: predicated region body
PF: predicated region fallthrough
CT: control target
= control target key end

     0   :  { %10 = vsyncpa [#allocation4], 0  ;;  %s837_s0 = inlined_call_operand.hbm [shape: bf16[34,128], index: 0, kind: input, shape index: {}]   ;;  %s838_s1 = inlined_call_operand.hbm [shape: bf16[128,256], index: 1, kind: input, shape index: {}]   ;;  %s839_s2 = inlined_call_operand.vmem [shape: f32[1,256], index: 2, kind: input, shape index: {}]   ;;  %s840_s3 = inlined_call_operand.hbm [shape: bf16[256,128], index: 3, kind: input, shape index: {}]   ;;  %s841_s4 = inlined_call_operand.vmem [shape: f32[1,128], index: 4, kind: input, shape index: {}]   ;;  %s842_s5 = inlined_call_operand.hbm [shape: f32[34,128], index: 5, kind: output, shape index: {}]  }
   0x1   :  { %11 = vsyncpa [#allocation7], 0 }
   0x2   :  { %12 = vsyncpa [#allocation5], 0  ;;  %s737_s18 = smov [#allocation6]   ;;  %s643_s22 = scalar_lea.hbm %s838_s1, 2048 }
   0x3   :  { %s30_s19 = sshll.u32 %s737_s18, 4  ;;  %p644_p0 = scmp.ne.s32.totalorder %s838_s1, %s643_s22  ;;  %s31_s19 = int_to_ptr.vmem [resolvable:$true] %s30_s19 }
   0x4   :  { %p647_p1 = scmp.lt.u32.totalorder %s643_s22, %s838_s1 }
   0x6   :  { %p649_p2 = pnand %p647_p1, %p644_p0 }
   0x8   :  { %652 = shalt.err (!%p649_p2)
}
   0x9   :  { %s653_s27 = scalar_lea.vmem %s31_s19, 2048  ;;  %p658_p4 = scmp.lt.s32.totalorder %s31_s19, %s31_s19 }
   0xa   :  { %p654_p3 = scmp.ne.s32.totalorder %s31_s19, %s653_s27  ;;  %p659_p5 = scmp.lt.s32.totalorder %s653_s27, %s653_s27 }
   0xc   :  { %p660_p6 = por %p659_p5, %p658_p4 }
   0xe   :  { %p661_p7 = pnand %p660_p6, %p654_p3 }
  0x10   :  { %664 = shalt.err (!%p661_p7)
}
  0x11   :  { %s738_s28 = smov 128   ;;  %s739_s29 = smov 8  }
  0x12   :  { %36 = dma.hbm_to_vmem [thread:$0]  %s838_s1, 2048, %s31_s19, [#allocation7], %s738_s28, %s738_s28, %s739_s29  }
  0x13   :  { %s740_s7 = smov [#allocation3]   ;;  %s665_s11 = scalar_lea.hbm %s837_s0, 320 }
  0x14   :  { %s18_s8 = sshll.u32 %s740_s7, 4  ;;  %p666_p8 = scmp.ne.s32.totalorder %s837_s0, %s665_s11  ;;  %s19_s8 = int_to_ptr.vmem [resolvable:$true] %s18_s8 }
  0x15   :  { %p669_p9 = scmp.lt.u32.totalorder %s665_s11, %s837_s0 }
  0x17   :  { %p671_p10 = pnand %p669_p9, %p666_p8 }
  0x19   :  { %674 = shalt.err (!%p671_p10)
}
  0x1a   :  { %s675_s16 = scalar_lea.vmem %s19_s8, 320  ;;  %p680_p12 = scmp.lt.s32.totalorder %s19_s8, %s19_s8 }
  0x1b   :  { %p676_p11 = scmp.ne.s32.totalorder %s19_s8, %s675_s16  ;;  %p681_p13 = scmp.lt.s32.totalorder %s675_s16, %s675_s16 }
  0x1d   :  { %p682_p0 = por %p681_p13, %p680_p12 }
  0x1f   :  { %p683_p1 = pnand %p682_p0, %p676_p11 }
  0x21   :  { %686 = shalt.err (!%p683_p1)
}
  0x22   :  { %s741_s1 = smov 64   ;;  %s742_s17 = smov 4  }
  0x23   :  { %24 = dma.hbm_to_vmem [thread:$0]  %s837_s0, 320, %s19_s8, [#allocation4], %s741_s1, %s741_s1, %s742_s17  }
  0x24   :  { %s743_s20 = smov [#allocation8]   ;;  %s687_s24 = scalar_lea.hbm %s840_s3, 2048 }
  0x25   :  { %s44_s21 = sshll.u32 %s743_s20, 4  ;;  %p688_p2 = scmp.ne.s32.totalorder %s840_s3, %s687_s24  ;;  %s45_s21 = int_to_ptr.vmem [resolvable:$true] %s44_s21 }
  0x26   :  { %p691_p3 = scmp.lt.u32.totalorder %s687_s24, %s840_s3 }
  0x28   :  { %p693_p4 = pnand %p691_p3, %p688_p2 }
  0x2a   :  { %696 = shalt.err (!%p693_p4)
}
  0x2b   :  { %s697_s6 = scalar_lea.vmem %s45_s21, 2048  ;;  %p702_p6 = scmp.lt.s32.totalorder %s45_s21, %s45_s21 }
  0x2c   :  { %p698_p5 = scmp.ne.s32.totalorder %s45_s21, %s697_s6  ;;  %p703_p7 = scmp.lt.s32.totalorder %s697_s6, %s697_s6 }
  0x2e   :  { %p704_p8 = por %p703_p7, %p702_p6 }
  0x30   :  { %p705_p9 = pnand %p704_p8, %p698_p5 }
  0x32   :  { %708 = shalt.err (!%p705_p9)
}
  0x33   :  { %50 = dma.hbm_to_vmem [thread:$0]  %s840_s3, 2048, %s45_s21, [#allocation7], %s741_s1, %s741_s1, %s742_s17  }
  0x34   :  { %731 = dma.done.wait [#allocation4], 320  }
  0x35   :  { %732 = vsyncadd [#allocation4], 4294966976 }
  0x36   :  { %733 = dma.done.wait [#allocation7], 4096  }
  0x37   :  { %734 = vsyncadd [#allocation7], 4294963200  ;;  %v744_v0 = vmov 0   ;;  %v600_v1 = vld [vmem:[#allocation6 + $0x4] ss:$8 sps:$4 sm:$0xff]   ;;  %v631_v16 = vld [vmem:[#allocation8 + $0x50] sm:$0xff]   ;;  %v95_v36 = vlaneseq }
  0x38   :  { %233 = vmatprep.mubr.bf16.mxu0 %v744_v0  ;;  %v602_v2 = vld [vmem:[#allocation6] ss:$8 sps:$4 sm:$0xff]   ;;  %201 = vmatprep.subr.bf16.mxu0 %v600_v1  ;;  %v603_v3 = vld [vmem:[#allocation6 + $0x14] ss:$8 sps:$4 sm:$0xff]   ;;  %v605_v4 = vld [vmem:[#allocation6 + $0x10] ss:$8 sps:$4 sm:$0xff]  }
  0x39   :  { %202 = vmatpush1.bf16.msra.mxu0 %v602_v2  ;;  %v606_v5 = vld [vmem:[#allocation6 + $0x24] ss:$8 sps:$4 sm:$0xff]   ;;  %v608_v6 = vld [vmem:[#allocation6 + $0x20] ss:$8 sps:$4 sm:$0xff]   ;;  %v609_v7 = vld [vmem:[#allocation6 + $0x34] ss:$8 sps:$4 sm:$0xff]  }
  0x3a   :  { %203 = vmatprep.subr.bf16.mxu0 %v603_v3  ;;  %v611_v8 = vld [vmem:[#allocation6 + $0x30] ss:$8 sps:$4 sm:$0xff]   ;;  %v612_v9 = vld [vmem:[#allocation6 + $0x44] ss:$8 sps:$4 sm:$0xff]   ;;  %v614_v10 = vld [vmem:[#allocation6 + $0x40] ss:$8 sps:$4 sm:$0xff]  }
  0x3b   :  { %v627_v11 = vld [vmem:[#allocation8 + $0x40] sm:$0xff]   ;;  %v615_v12 = vld [vmem:[#allocation6 + $0x54] ss:$8 sps:$4 sm:$0xff]   ;;  %v629_v14 = vld [vmem:[#allocation8 + $0x48] sm:$0xff]   ;;  %v96_v37 = vshrl.u32 %v95_v36, 7 }
  0x3c   :  { %556 = vmatprep.subr.bf16.mxu1 %v627_v11  ;;  %v628_v13 = vld [vmem:[#allocation8] sm:$0xff]   ;;  %v630_v15 = vld [vmem:[#allocation8 + $0x8] sm:$0xff]   ;;  %v617_v17 = vld [vmem:[#allocation6 + $0x50] ss:$8 sps:$4 sm:$0xff]  }
  0x3d   :  { %204 = vmatpush1.bf16.msra.mxu0 %v605_v4  ;;  %557 = vmatpush3.bf16.msra.mxu1 %v628_v13  ;;  %v618_v18 = vld [vmem:[#allocation6 + $0x64] ss:$8 sps:$4 sm:$0xff]   ;;  %v620_v19 = vld [vmem:[#allocation6 + $0x60] ss:$8 sps:$4 sm:$0xff]   ;;  %v632_v20 = vld [vmem:[#allocation8 + $0x10] sm:$0xff]   ;;  %v97_v38 = vsub.s32 0, %v96_v37 }
  0x3e   :  { %205 = vmatprep.subr.bf16.mxu0 %v606_v5  ;;  %558 = vmatprep.subr.bf16.mxu1 %v629_v14  ;;  %v633_v21 = vld [vmem:[#allocation8 + $0x58] sm:$0xff]   ;;  %v635_v24 = vld [vmem:[#allocation8 + $0x60] sm:$0xff]   ;;  %v624_v27 = vld [vmem:[#allocation3] sm:$0xff]   ;;  %v101_v40 = vsub.s32 1, %v96_v37 }
  0x3f   :  { %v621_v22 = vld [vmem:[#allocation6 + $0x74] ss:$8 sps:$4 sm:$0xff]   ;;  %v623_v25 = vld [vmem:[#allocation6 + $0x70] ss:$8 sps:$4 sm:$0xff]   ;;  %v636_v26 = vld [vmem:[#allocation8 + $0x20] sm:$0xff]  }
  0x40   :  { %v634_v23 = vld [vmem:[#allocation8 + $0x18] sm:$0xff]   ;;  %v637_v28 = vld [vmem:[#allocation8 + $0x68] sm:$0xff]   ;;  %v639_v32 = vld [vmem:[#allocation8 + $0x70] sm:$0xff]  }
  0x41   :  { %206 = vmatpush1.bf16.msra.mxu0 %v608_v6  ;;  %559 = vmatpush3.bf16.msra.mxu1 %v630_v15  ;;  %v625_v29 = vld [vmem:[#allocation3 + $0x8] sm:$0xff]   ;;  %v626_v30 = vld [vmem:[#allocation3 + $0x10] ss:$0 sps:$4 sm:$0x11]   ;;  %v638_v31 = vld [vmem:[#allocation8 + $0x28] sm:$0xff]  }
  0x42   :  { %207 = vmatprep.subr.bf16.mxu0 %v609_v7  ;;  %560 = vmatprep.subr.bf16.mxu1 %v631_v16  ;;  %v640_v33 = vld [vmem:[#allocation8 + $0x30] sm:$0xff]   ;;  %v641_v34 = vld [vmem:[#allocation8 + $0x78] sm:$0xff]   ;;  %v93_v39 = vld [vmem:[%s839_s2] sm:$0x3] }
  0x43   :  { %v642_v35 = vld [vmem:[#allocation8 + $0x38] sm:$0xff]   ;;  %v98_v41 = vrot.slane %v93_v39, %v97_v38  ;;  %v102_v42 = vrot.slane %v93_v39, %v101_v40 }
  0x45   :  { %208 = vmatpush1.bf16.msra.mxu0 %v611_v8  ;;  %561 = vmatpush3.bf16.msra.mxu1 %v632_v20 }
  0x46   :  { %209 = vmatprep.subr.bf16.mxu0 %v612_v9  ;;  %562 = vmatprep.subr.bf16.mxu1 %v633_v21 }
  0x49   :  { %210 = vmatpush1.bf16.msra.mxu0 %v614_v10  ;;  %563 = vmatpush3.bf16.msra.mxu1 %v634_v23  ;;  %v555_v23 = vld [vmem:[%s841_s4] ss:$0 sm:$0xff]  ;;  %s746_s4 = smov [#allocation9]  }
  0x4a   :  { %211 = vmatprep.subr.bf16.mxu0 %v615_v12  ;;  %564 = vmatprep.subr.bf16.mxu1 %v635_v24  ;;  %s507_s10 = sshll.u32 %s746_s4, 4  ;;  %s508_s10 = int_to_ptr.vmem [resolvable:$true] %s507_s10 }
  0x4b   :  { %s709_s11 = scalar_lea.vmem %s508_s10, 640  ;;  %p714_p11 = scmp.lt.s32.totalorder %s508_s10, %s508_s10 }
  0x4c   :  { %p710_p10 = scmp.ne.s32.totalorder %s508_s10, %s709_s11  ;;  %p715_p12 = scmp.lt.s32.totalorder %s709_s11, %s709_s11 }
  0x4d   :  { %212 = vmatpush1.bf16.msra.mxu0 %v617_v17  ;;  %565 = vmatpush3.bf16.msra.mxu1 %v636_v26  ;;  %v745_v17 = vmov 0.0  }
  0x4e   :  { %213 = vmatprep.subr.bf16.mxu0 %v618_v18  ;;  %566 = vmatprep.subr.bf16.mxu1 %v637_v28  ;;  %71 = vst [vmem:[#allocation2 + $0x20] sm:$0x3] %v745_v17  ;;  %p716_p13 = por %p715_p12, %p714_p11 }
  0x50   :  { %p717_p0 = pnand %p716_p13, %p710_p10 }
  0x51   :  { %214 = vmatpush1.bf16.msra.mxu0 %v620_v19  ;;  %567 = vmatpush3.bf16.msra.mxu1 %v638_v31 }
  0x52   :  { %215 = vmatprep.subr.bf16.mxu0 %v621_v22  ;;  %568 = vmatprep.subr.bf16.mxu1 %v639_v32 }
  0x55   :  { %216 = vmatpush1.bf16.msra.mxu0 %v623_v25  ;;  %569 = vmatpush3.bf16.msra.mxu1 %v640_v33  ;;  %v276_v36 = vld [vmem:[#allocation2 + $0x20] sm:$0x3] }
  0x56   :  { %570 = vmatprep.subr.bf16.mxu1 %v641_v34 }
  0x58   :  { %234 = vmatmul.mubr.bf16.vlgmr.msra.gmra.mrb[0].mxu0 %v624_v27 }
  0x59   :  { %243 = vmatprep.mubr.bf16.mxu0 %v744_v0  ;;  %571 = vmatpush3.bf16.msra.mxu1 %v642_v35 }
  0x60   :  { %244 = vmatmul.mubr.bf16.gmra.mrb[4].mxu0 %v625_v29 }
  0x61   :  { %253 = vmatprep.mubr.bf16.mxu0 %v744_v0 }
  0x68   :  { %254 = vmatmul.mubr.bf16.gmra.mrb[8].mxu0 %v626_v30 }
 0x12b   :  { %v235_v43 = vpop.f32.mrb[0].mxu0 }
 0x12c   :  { %v236_v44 = vadd.f32 %v235_v43, %v98_v41  ;;  %v237_v45 = vpop.f32.mrb[1].mxu0 }
 0x12d   :  { %v238_v46 = vadd.f32 %v237_v45, %v102_v42  ;;  %v239_v47 = vpop.f32.mrb[2].mxu0 }
 0x12e   :  { %v240_v48 = vadd.f32 %v239_v47, %v98_v41  ;;  %v241_v49 = vpop.f32.mrb[3].mxu0  ;;  %v262_v51 = vmax.f32 %v236_v44, 0.0 }
 0x12f   :  { %v242_v50 = vadd.f32 %v241_v49, %v102_v42  ;;  %v263_v53 = vmax.f32 %v238_v46, 0.0 }
 0x130   :  { %v264_v52 = vmax.f32 %v240_v48, 0.0 }
 0x131   :  { %v265_v54 = vmax.f32 %v242_v50, 0.0 }
 0x132   :  { %v277_v55 = vpack.c.bf16 %v264_v52, %v262_v51 }
 0x133   :  { %v245_v56 = vpop.f32.mrb[4].mxu0  ;;  %v278_v57 = vpack.c.bf16 %v265_v54, %v263_v53 }
 0x134   :  { %v246_v58 = vadd.f32 %v245_v56, %v98_v41  ;;  %v247_v59 = vpop.f32.mrb[5].mxu0 }
 0x135   :  { %v248_v60 = vadd.f32 %v247_v59, %v102_v42  ;;  %v249_v61 = vpop.f32.mrb[6].mxu0  ;;  %443 = vmatprep.mubr.bf16.mxu1 %v278_v57 }
 0x136   :  { %v250_v62 = vadd.f32 %v249_v61, %v98_v41  ;;  %v251_v63 = vpop.f32.mrb[7].mxu0  ;;  %444 = vmatmul.mubr.bf16.vlgmr.msra.gmra.mrb[0].mxu1 %v277_v55  ;;  %v266_v1 = vmax.f32 %v246_v58, 0.0 }
 0x137   :  { %v252_v0 = vadd.f32 %v251_v63, %v102_v42  ;;  %v267_v3 = vmax.f32 %v248_v60, 0.0 }
 0x138   :  { %v268_v2 = vmax.f32 %v250_v62, 0.0 }
 0x139   :  { %v269_v4 = vmax.f32 %v252_v0, 0.0 }
 0x13a   :  { %v279_v5 = vpack.c.bf16 %v268_v2, %v266_v1 }
 0x13b   :  { %v280_v6 = vpack.c.bf16 %v269_v4, %v267_v3  ;;  %v255_v7 = vpop.f32.mrb[8].mxu0 }
 0x13c   :  { %v256_v8 = vadd.f32 %v255_v7, %v98_v41  ;;  %v257_v9 = vpop.f32.mrb[9].mxu0 }
 0x13d   :  { %v258_v10 = vadd.f32 %v257_v9, %v102_v42  ;;  %v259_v11 = vpop.f32.mrb[10].mxu0  ;;  %451 = vmatprep.mubr.bf16.mxu1 %v280_v6 }
 0x13e   :  { %v260_v12 = vpop.f32.mrb[11].mxu0  ;;  %452 = vmatmul.mubr.bf16.gmra.mrb[4].mxu1 %v279_v5  ;;  %v270_v14 = vmax.f32 %v256_v8, 0.0 }
 0x13f   :  { %v271_v13 = vmax.f32 %v258_v10, 0.0 }
 0x140   :  { %v281_v16 = vpack.c.bf16 %v270_v14, %v270_v14 }
 0x141   :  { %v282_v15 = vpack.c.bf16 %v271_v13, %v271_v13 }
 0x143   :  { %459 = vmatprep.mubr.bf16.mxu1 %v282_v15 }
 0x146   :  { %460 = vmatmul.mubr.bf16.gmra.mrb[8].mxu1 %v281_v16 }
 0x209   :  { %v572_v18 = vpop.f32.mrb[0].mxu1 }
 0x20a   :  { %v573_v19 = vpop.f32.mrb[1].mxu1 }
 0x20b   :  { %v574_v20 = vadd.f32 %v573_v19, %v572_v18  ;;  %v575_v21 = vpop.f32.mrb[2].mxu1 }
 0x20c   :  { %v576_v22 = vpop.f32.mrb[3].mxu1 }
 0x20d   :  { %v577_v24 = vadd.f32 %v576_v22, %v575_v21  ;;  %v492_v25 = vadd.f32 %v574_v20, %v555_v23 }
 0x20f   :  { %v493_v27 = vadd.f32 %v577_v24, %v555_v23  ;;  %497 = vst [vmem:[#allocation9] sm:$0xff] %v492_v25 }
 0x211   :  { %v578_v26 = vpop.f32.mrb[4].mxu1  ;;  %498 = vst [vmem:[#allocation9 + $0x8] sm:$0xff] %v493_v27 }
 0x212   :  { %v579_v28 = vpop.f32.mrb[5].mxu1 }
 0x213   :  { %v580_v29 = vadd.f32 %v579_v28, %v578_v26  ;;  %v581_v30 = vpop.f32.mrb[6].mxu1 }
 0x214   :  { %v582_v31 = vpop.f32.mrb[7].mxu1 }
 0x215   :  { %v583_v32 = vadd.f32 %v582_v31, %v581_v30  ;;  %v494_v33 = vadd.f32 %v580_v29, %v555_v23 }
 0x217   :  { %v495_v35 = vadd.f32 %v583_v32, %v555_v23  ;;  %499 = vst [vmem:[#allocation9 + $0x10] sm:$0xff] %v494_v33 }
 0x219   :  { %v584_v34 = vpop.f32.mrb[8].mxu1  ;;  %500 = vst [vmem:[#allocation9 + $0x18] sm:$0xff] %v495_v35 }
 0x21a   :  { %v585_v37 = vpop.f32.mrb[9].mxu1 }
 0x21b   :  { %v586_v38 = vadd.f32 %v585_v37, %v584_v34  ;;  %v587_v39 = vpop.f32.mrb[10].mxu1 }
 0x21c   :  { %v588_v40 = vpop.f32.mrb[11].mxu1 }
 0x21d   :  { %v471_v41 = vadd.f32 %v586_v38, %v276_v36 }
 0x21f   :  { %476 = vst [vmem:[#allocation2 + $0x20] sm:$0x3] %v471_v41 }
 0x226   :  { %v484_v42 = vld [vmem:[#allocation2 + $0x20] sm:$0x3] }
 0x227   :  { %v496_v43 = vadd.f32 %v555_v23, %v484_v42 }
 0x229   :  { %501 = vst [vmem:[#allocation9 + $0x20] sm:$0x3] %v496_v43 }
 0x22a   :  { %720 = shalt.err (!%p717_p0)
}
 0x22b   :  { %s721_s14 = scalar_lea.hbm %s842_s5, 640 }
 0x22c   :  { %p722_p1 = scmp.ne.s32.totalorder %s842_s5, %s721_s14  ;;  %p725_p2 = scmp.lt.u32.totalorder %s721_s14, %s842_s5 }
 0x22e   :  { %p727_p3 = pnand %p725_p2, %p722_p1 }
 0x230   :  { %730 = shalt.err (!%p727_p3)
}
 0x231   :  { %513 = dma.vmem_to_hbm [thread:$0]  %s508_s10, 640, %s842_s5, [#allocation5], %s738_s28, %s738_s28, %s739_s29  }
 0x232   :  { %735 = dma.done.wait [#allocation5], 640  }
 0x233   :  { %736 = vsyncadd [#allocation5], 4294966656 }
 0x234   :  { %517 = vsyncpa [#allocation4], 1 }
 0x235   :  { %518 = vsyncpa [#allocation7], 1 }
 0x236   :  { %519 = vsyncpa [#allocation5], 1 }

</bundles_post_ra>
